<compile_context>
chip_gen: v6e
topology: v6e:2x2x1
jax: 0.10.0
libtpu: 0.0.40
codegen_flags: <defaults>
</compile_context>

<pallas_src>
import jax
import jax.numpy as jnp
from jax.experimental import pallas as pl
from jax.experimental.pallas import tpu as pltpu


def _prompt_broadcast_kernel(prompt_ref, out_ref):
    # prompt_ref: (1, TF) tile of the flattened prompt (resident in VMEM).
    # out_ref:    (TB, TF) output tile -> replicate the prompt row TB times.
    out_ref[...] = jnp.broadcast_to(prompt_ref[...], out_ref.shape)


def prompt_projector_forward(prompt: jax.Array, batch_size: int) -> jax.Array:
    """Expand prompt (P, H) -> (batch_size, P, H) via a Pallas kernel."""
    P, H = prompt.shape
    F = P * H
    dtype_bytes = jnp.dtype(prompt.dtype).itemsize

    # ---- Tile selection -------------------------------------------------
    # Feature-axis tile: take the full flattened width if it is small enough,
    # otherwise a multiple of 128 lanes capped at ~2 MiB per row-chunk.
    max_tf_bytes = 2 << 20
    if F * dtype_bytes <= max_tf_bytes or F <= 128:
        TF = F
    else:
        TF = max(128, ((max_tf_bytes // dtype_bytes) // 128) * 128)

    # Batch-rows per tile: aim for ~1 MiB output tiles. TB must be a multiple
    # of 8 (sublane) or equal the full batch dimension.
    target_tile_bytes = 1 << 20
    row_bytes = TF * dtype_bytes
    tb = max(1, target_tile_bytes // row_bytes)
    if tb >= batch_size or batch_size <= 8:
        TB = batch_size
    else:
        TB = max(8, (tb // 8) * 8)  # multiple of 8, and < batch_size here

    grid = (pl.cdiv(F, TF), pl.cdiv(batch_size, TB))  # feature outer, batch inner

    # VMEM budget: double-buffered output tile + (small) double-buffered prompt
    # tile, with generous headroom. Stays well under v7x's 64 MiB physical VMEM.
    vmem_needed = 2 * (TB * TF + TF) * dtype_bytes
    vmem_limit = int(min(max(2 * vmem_needed + (2 << 20), 16 << 20), 64 << 20))

    prompt_flat = prompt.reshape(1, F)

    out_flat = pl.pallas_call(
        _prompt_broadcast_kernel,
        out_shape=jax.ShapeDtypeStruct((batch_size, F), prompt.dtype),
        grid_spec=pltpu.PrefetchScalarGridSpec(
            num_scalar_prefetch=0,
            grid=grid,
            in_specs=[
                # Block index depends only on the feature axis -> prompt chunk
                # is fetched once and stays resident across the batch sweep.
                pl.BlockSpec((1, TF), lambda f, b: (0, f)),
            ],
            out_specs=pl.BlockSpec((TB, TF), lambda f, b: (b, f)),
        ),
        compiler_params=pltpu.CompilerParams(
            dimension_semantics=("parallel", "parallel"),
            vmem_limit_bytes=vmem_limit,
        ),
        cost_estimate=pl.CostEstimate(
            flops=0,
            transcendentals=0,
            bytes_accessed=(batch_size * F + F) * dtype_bytes,
        ),
    )(prompt_flat)

    return out_flat.reshape(batch_size, P, H)


if __name__ == "__main__":
    # Deterministic parameter init (matches torch.randn(prompt_length, hidden_size)
    # in distribution; values are synthetic, not a checkpoint load).
    prompt_length = 8
    hidden_size = 32
    batch_size = 2

    key = jax.random.PRNGKey(0)
    prompt = jax.random.normal(key, (prompt_length, hidden_size), dtype=jnp.float32)

    out = prompt_projector_forward(prompt, batch_size)
    out = jax.block_until_ready(out)

    # Sanity check against the pure-JAX reference of the expand semantics.
    ref = jnp.broadcast_to(prompt[None, :, :], (batch_size, prompt_length, hidden_size))
    assert out.shape == (batch_size, prompt_length, hidden_size)
    assert out.dtype == prompt.dtype
    assert bool(jnp.array_equal(out, ref))

    print("KERNEL_OK")
</pallas_src>

<mosaic_0001>
module attributes {stable_mosaic.version = 11 : i64} {
  func.func @_prompt_broadcast_kernel(%arg0: i32, %arg1: i32, %arg2: memref<1x256xf32, #tpu.memory_space<vmem>>, %arg3: memref<2x256xf32, #tpu.memory_space<vmem>>) attributes {dimension_semantics = [#tpu.dimension_semantics<parallel>, #tpu.dimension_semantics<parallel>], iteration_bounds = array<i64: 1, 1>, scalar_prefetch = 0 : i64, scratch_operands = 0 : i64, tpu.core_type = #tpu.core_type<tc>, window_params = [{transform_indices = @transform_0, window_bounds = array<i64: 1, 256>}, {transform_indices = @transform_1, window_bounds = array<i64: 2, 256>}]} {
    %c0 = arith.constant 0 : index
    %c0_0 = arith.constant 0 : index
    %0 = vector.load %arg2[%c0, %c0_0] : memref<1x256xf32, #tpu.memory_space<vmem>>, vector<1x256xf32>
    %1 = vector.shape_cast %0 : vector<1x256xf32> to vector<1x256xf32>
    %2 = vector.broadcast %1 : vector<1x256xf32> to vector<2x256xf32>
    %c0_1 = arith.constant 0 : index
    %c0_2 = arith.constant 0 : index
    %3 = vector.load %arg3[%c0_1, %c0_2] : memref<2x256xf32, #tpu.memory_space<vmem>>, vector<2x256xf32>
    tpu.vector_store %arg3[%c0_1, %c0_2], %2 {strides = array<i32>} : memref<2x256xf32, #tpu.memory_space<vmem>>, vector<2x256xf32>,
    return
  }
  func.func @transform_0(%arg0: i32, %arg1: i32) -> (i32, i32) {
    %c0_i32 = arith.constant 0 : i32
    %c0_i32_0 = arith.constant 0 : i32
    return %c0_i32, %arg0 : i32, i32
  }
  func.func @transform_1(%arg0: i32, %arg1: i32) -> (i32, i32) {
    %c0_i32 = arith.constant 0 : i32
    return %arg1, %arg0 : i32, i32
  }
}

</mosaic_0001>

<bundles_post_ra>
// kernel: tpu_custom_call.1
= control target key start
LH: loop header
LB: loop body
LE: loop exit
PB: predicated region body
PF: predicated region fallthrough
CT: control target
= control target key end

     0   :  { %6 = vsyncpa [#allocation3], 0  ;;  %s121_s0 = inlined_call_operand.hbm [shape: f32[1,256], index: 0, kind: input, shape index: {}]   ;;  %s122_s1 = inlined_call_operand.hbm [shape: f32[2,256], index: 1, kind: output, shape index: {}]  }
   0x1   :  { %7 = vsyncpa [#allocation4], 0  ;;  %s103_s6 = smov [#allocation2]  }
   0x2   :  { %s14_s7 = sshll.u32 %s103_s6, 4  ;;  %s15_s7 = int_to_ptr.vmem [resolvable:$true] %s14_s7 }
   0x3   :  { %s67_s8 = scalar_lea.vmem %s15_s7, 32  ;;  %p72_p1 = scmp.lt.s32.totalorder %s15_s7, %s15_s7 }
   0x4   :  { %p68_p0 = scmp.ne.s32.totalorder %s15_s7, %s67_s8  ;;  %p73_p2 = scmp.lt.s32.totalorder %s67_s8, %s67_s8 }
   0x6   :  { %p74_p3 = por %p73_p2, %p72_p1 }
   0x8   :  { %p75_p4 = pnand %p74_p3, %p68_p0 }
   0xa   :  { %78 = shalt.err (!%p75_p4)
}
   0xb   :  { %17 = dma.hbm_to_vmem [thread:$0]  %s121_s0, 32, %s15_s7, [#allocation3]  }
   0xc   :  { %99 = dma.done.wait [#allocation3], 32  }
   0xd   :  { %100 = vsyncadd [#allocation3], 4294967264  ;;  %v23_v0 = vlaneseq  ;;  %v21_v4 = vld [vmem:[#allocation2] sm:$0x3]  ;;  %s104_s11 = smov [#allocation5]  }
   0xe   :  { %s47_s12 = sshll.u32 %s104_s11, 4  ;;  %s48_s12 = int_to_ptr.vmem [resolvable:$true] %s47_s12 }
   0xf   :  { %v24_v1 = vshrl.u32 %v23_v0, 7  ;;  %s79_s13 = scalar_lea.vmem %s48_s12, 64  ;;  %p84_p6 = scmp.lt.s32.totalorder %s48_s12, %s48_s12 }
  0x10   :  { %p80_p5 = scmp.ne.s32.totalorder %s48_s12, %s79_s13  ;;  %p85_p7 = scmp.lt.s32.totalorder %s79_s13, %s79_s13 }
  0x11   :  { %v25_v2 = vsub.s32 0, %v24_v1  ;;  %v29_v3 = vsub.s32 1, %v24_v1 }
  0x12   :  { %p86_p8 = por %p85_p7, %p84_p6 }
  0x13   :  { %v26_v5 = vrot.slane %v21_v4, %v25_v2  ;;  %v30_v6 = vrot.slane %v21_v4, %v29_v3 }
  0x14   :  { %p87_p9 = pnand %p86_p8, %p80_p5 }
  0x15   :  { %v31_v7 = vcombine.low %v26_v5, %v30_v6 }
  0x17   :  { %56 = vst.sshfl [vmem:[#allocation5] sm:$0x33 pattern:$0x76325410] %v31_v7 }
  0x18   :  { %90 = shalt.err (!%p87_p9)
}
  0x19   :  { %50 = dma.vmem_to_hbm [thread:$0]  %s48_s12, 64, %s122_s1, [#allocation4]  }
  0x1a   :  { %101 = dma.done.wait [#allocation4], 64  }
  0x1b   :  { %102 = vsyncadd [#allocation4], 4294967232 }
  0x1c   :  { %54 = vsyncpa [#allocation3], 1 }
  0x1d   :  { %55 = vsyncpa [#allocation4], 1 }

</bundles_post_ra>
